<compile_context>
chip_gen: v5e
topology: v5e:2x2
jax: 0.10.0
libtpu: 0.0.40
codegen_flags: <defaults>
</compile_context>

<pallas_src>
import functools

import jax
import jax.numpy as jnp
from jax.experimental import pallas as pl
from jax.experimental.pallas import tpu as pltpu

LN_EPS = 1e-5


def _falcon_decoder_layer_kernel(
    x_ref, mask_ref, cos_ref, sin_ref,
    ln_w_ref, ln_b_ref, w_qkv_ref, w_dense_ref, w_h4h_ref, w_4hh_ref,
    out_ref, k_out_ref, v_out_ref,
    *, num_heads, head_dim, matmul_dtype,
):
    """One batch element of a Falcon (parallel-attn, multi-query) decoder layer."""
    x = x_ref[0]          # [seq, hidden]
    mask = mask_ref[0]    # [seq, seq] additive mask (0 / -1e9)
    cos = cos_ref[...]    # [seq, head_dim]
    sin = sin_ref[...]

    def mm(a, w):
        # PyTorch Linear semantics y = a @ w.T with w stored [out, in]:
        # contract dim 1 of both operands -> no transposed weight copy in HBM.
        return jax.lax.dot_general(
            a.astype(matmul_dtype), w.astype(matmul_dtype),
            dimension_numbers=(((1,), (1,)), ((), ())),
            preferred_element_type=jnp.float32,
        )

    # ---- input layernorm ----
    mu = jnp.mean(x, axis=-1, keepdims=True)
    var = jnp.mean(jnp.square(x - mu), axis=-1, keepdims=True)
    ln = (x - mu) * jax.lax.rsqrt(var + LN_EPS) * ln_w_ref[0] + ln_b_ref[0]

    # ---- fused QKV projection (q: num_heads heads, k/v: 1 shared head) ----
    qkv = mm(ln, w_qkv_ref[...])                       # [seq, (nh+2)*hd]
    q = qkv[:, : num_heads * head_dim]
    k = qkv[:, num_heads * head_dim:(num_heads + 1) * head_dim]
    v = qkv[:, (num_heads + 1) * head_dim:]

    half = head_dim // 2

    def rope(t):  # rotate-half rotary embedding
        rot = jnp.concatenate([-t[:, half:], t[:, :half]], axis=-1)
        return t * cos + rot * sin

    k_rot = rope(k)
    scale = 1.0 / (head_dim ** 0.5)

    # ---- attention: static loop over query heads, shared K/V ----
    heads = []
    for h in range(num_heads):
        q_h = rope(q[:, h * head_dim:(h + 1) * head_dim])
        s = jax.lax.dot_general(
            q_h, k_rot, (((1,), (1,)), ((), ())),
            preferred_element_type=jnp.float32) * scale + mask
        s = s - jnp.max(s, axis=-1, keepdims=True)
        p = jnp.exp(s)
        p = p / jnp.sum(p, axis=-1, keepdims=True)
        heads.append(
            jnp.dot(p.astype(matmul_dtype), v.astype(matmul_dtype),
                    preferred_element_type=jnp.float32))
    attn = jnp.concatenate(heads, axis=-1)             # [seq, hidden]
    attn_out = mm(attn, w_dense_ref[...])

    # ---- MLP (parallel branch on the same layernorm output) ----
    h4 = jax.nn.gelu(mm(ln, w_h4h_ref[...]), approximate=True)
    mlp_out = mm(h4, w_4hh_ref[...])

    out_ref[0] = (x + attn_out + mlp_out).astype(out_ref.dtype)
    k_out_ref[0] = k_rot.astype(k_out_ref.dtype)
    v_out_ref[0] = v.astype(v_out_ref.dtype)


@functools.partial(jax.jit, static_argnames=("num_heads", "head_dim"))
def falcon_decoder_layer(hidden_states, attention_mask, cos, sin,
                         ln_w, ln_b, w_qkv, w_dense, w_h4h, w_4hh,
                         *, num_heads, head_dim):
    """hidden_states: [batch, seq, hidden] -> (new_hidden, present_k, present_v)."""
    batch, seq, hidden = hidden_states.shape
    qkv_out = (num_heads + 2) * head_dim
    fourh = 4 * hidden

    kernel = functools.partial(
        _falcon_decoder_layer_kernel,
        num_heads=num_heads, head_dim=head_dim, matmul_dtype=jnp.float32)

    # Advisory cost hint for XLA scheduling around the custom call.
    flops = (2 * batch * seq * hidden * (qkv_out + hidden + 2 * fourh)
             + 4 * batch * num_heads * seq * seq * head_dim)
    transcendentals = batch * (num_heads * seq * seq + seq * fourh)
    bytes_accessed = 4 * (2 * batch * seq * hidden + batch * seq * seq
                          + qkv_out * hidden + hidden * hidden
                          + 2 * fourh * hidden
                          + 2 * batch * seq * head_dim
                          + 2 * seq * head_dim + 2 * hidden)

    out_shape = (
        jax.ShapeDtypeStruct((batch, seq, hidden), hidden_states.dtype),
        jax.ShapeDtypeStruct((batch, seq, head_dim), hidden_states.dtype),
        jax.ShapeDtypeStruct((batch, seq, head_dim), hidden_states.dtype),
    )

    grid_spec = pltpu.PrefetchScalarGridSpec(
        num_scalar_prefetch=0,
        grid=(batch,),
        in_specs=[
            pl.BlockSpec((1, seq, hidden), lambda b: (b, 0, 0)),
            pl.BlockSpec((1, seq, seq), lambda b: (b, 0, 0)),
            pl.BlockSpec((seq, head_dim), lambda b: (0, 0)),
            pl.BlockSpec((seq, head_dim), lambda b: (0, 0)),
            pl.BlockSpec((1, hidden), lambda b: (0, 0)),
            pl.BlockSpec((1, hidden), lambda b: (0, 0)),
            pl.BlockSpec((qkv_out, hidden), lambda b: (0, 0)),
            pl.BlockSpec((hidden, hidden), lambda b: (0, 0)),
            pl.BlockSpec((fourh, hidden), lambda b: (0, 0)),
            pl.BlockSpec((hidden, fourh), lambda b: (0, 0)),
        ],
        out_specs=(
            pl.BlockSpec((1, seq, hidden), lambda b: (b, 0, 0)),
            pl.BlockSpec((1, seq, head_dim), lambda b: (b, 0, 0)),
            pl.BlockSpec((1, seq, head_dim), lambda b: (b, 0, 0)),
        ),
    )

    return pl.pallas_call(
        kernel,
        out_shape=out_shape,
        grid_spec=grid_spec,
        compiler_params=pltpu.CompilerParams(
            dimension_semantics=("parallel",),
            vmem_limit_bytes=32 * 1024 * 1024,
        ),
        cost_estimate=pl.CostEstimate(
            flops=flops, transcendentals=transcendentals,
            bytes_accessed=bytes_accessed),
    )(hidden_states, attention_mask, cos, sin,
      ln_w, ln_b, w_qkv, w_dense, w_h4h, w_4hh)


def two_way_sharding_decoder_forward(hidden_states, attention_mask, layer_params,
                                     cos, sin, *, num_heads, head_dim):
    """Mirrors TwoWayShardingDecoderLayer.forward: chained layers + flattened KV."""
    new_pkvs = []
    h = hidden_states
    for p in layer_params:
        h, k, v = falcon_decoder_layer(h, attention_mask, cos, sin, *p,
                                       num_heads=num_heads, head_dim=head_dim)
        new_pkvs.append((k, v))
    flat = []
    for k, v in new_pkvs:
        flat.extend((k, v))
    return (h, *flat)


# ---------------------------- pure-JAX reference ----------------------------
def _ref_layer(x, mask, cos, sin, ln_w, ln_b, w_qkv, w_dense, w_h4h, w_4hh,
               num_heads, head_dim):
    mu = x.mean(-1, keepdims=True)
    var = ((x - mu) ** 2).mean(-1, keepdims=True)
    ln = (x - mu) * jax.lax.rsqrt(var + LN_EPS) * ln_w[0] + ln_b[0]
    qkv = jnp.einsum("bsh,oh->bso", ln, w_qkv)
    nh, hd = num_heads, head_dim
    q = qkv[..., : nh * hd]
    k = qkv[..., nh * hd:(nh + 1) * hd]
    v = qkv[..., (nh + 1) * hd:]
    half = hd // 2

    def rope(t):
        rot = jnp.concatenate([-t[..., half:], t[..., :half]], axis=-1)
        return t * cos + rot * sin

    k_rot = rope(k)
    scale = 1.0 / (hd ** 0.5)
    heads = []
    for hh in range(nh):
        q_h = rope(q[..., hh * hd:(hh + 1) * hd])
        s = jnp.einsum("bqd,bkd->bqk", q_h, k_rot) * scale + mask
        s = s - s.max(-1, keepdims=True)
        p = jnp.exp(s)
        p = p / p.sum(-1, keepdims=True)
        heads.append(jnp.einsum("bqk,bkd->bqd", p, v))
    attn = jnp.concatenate(heads, axis=-1)
    attn_out = jnp.einsum("bsh,oh->bso", attn, w_dense)
    h4 = jax.nn.gelu(jnp.einsum("bsh,oh->bso", ln, w_h4h), approximate=True)
    mlp_out = jnp.einsum("bsf,of->bso", h4, w_4hh)
    return x + attn_out + mlp_out, k_rot, v


if __name__ == "__main__":
    # Small shapes consistent with the module's forward (layer count is
    # structural: the module unpacks exactly 40 (k, v) pairs).
    batch, seq, hidden = 2, 8, 32
    num_heads, head_dim = 2, 16
    num_layers = 40

    key = jax.random.PRNGKey(0)
    key, kx = jax.random.split(key)
    hidden_states = jax.random.normal(kx, (batch, seq, hidden), dtype=jnp.float32)

    # Additive causal attention mask.
    causal = jnp.tril(jnp.ones((seq, seq), dtype=bool))
    attention_mask = jnp.where(causal, 0.0, -1e9).astype(jnp.float32)
    attention_mask = jnp.broadcast_to(attention_mask, (batch, seq, seq))

    # Rotary tables (rotate-half convention), since alibi=None.
    inv_freq = 1.0 / (10000.0 ** (jnp.arange(0, head_dim, 2, dtype=jnp.float32)
                                  / head_dim))
    pos = jnp.arange(seq, dtype=jnp.float32)
    angles = pos[:, None] * inv_freq[None, :]
    cos = jnp.concatenate([jnp.cos(angles), jnp.cos(angles)], axis=-1)
    sin = jnp.concatenate([jnp.sin(angles), jnp.sin(angles)], axis=-1)

    # Deterministic synthetic per-layer weights (PyTorch Linear [out, in] layout).
    qkv_out = (num_heads + 2) * head_dim
    fourh = 4 * hidden
    layer_params = []
    for _ in range(num_layers):
        key, k1, k2, k3, k4, k5, k6 = jax.random.split(key, 7)
        ln_w = 1.0 + 0.02 * jax.random.normal(k1, (1, hidden), jnp.float32)
        ln_b = 0.02 * jax.random.normal(k2, (1, hidden), jnp.float32)
        w_qkv = jax.random.normal(k3, (qkv_out, hidden), jnp.float32) / jnp.sqrt(hidden)
        w_dense = 0.5 * jax.random.normal(k4, (hidden, hidden), jnp.float32) / jnp.sqrt(hidden)
        w_h4h = jax.random.normal(k5, (fourh, hidden), jnp.float32) / jnp.sqrt(hidden)
        w_4hh = 0.5 * jax.random.normal(k6, (hidden, fourh), jnp.float32) / jnp.sqrt(fourh)
        layer_params.append((ln_w, ln_b, w_qkv, w_dense, w_h4h, w_4hh))

    result = two_way_sharding_decoder_forward(
        hidden_states, attention_mask, layer_params, cos, sin,
        num_heads=num_heads, head_dim=head_dim)
    jax.block_until_ready(result)

    assert len(result) == 1 + 2 * num_layers
    assert result[0].shape == (batch, seq, hidden)

    # Correctness check vs. plain-JAX reference of the PyTorch semantics.
    # TODO(synk): dropout and the Falcon-40B "new_decoder_architecture" grouped
    # QKV head layout are not modeled; this implements the 7B multi-query,
    # parallel-attention variant (alibi=None, use_cache=True).
    h_ref = hidden_states
    ref_kvs = []
    for p in layer_params:
        h_ref, k_r, v_r = _ref_layer(h_ref, attention_mask, cos, sin, *p,
                                     num_heads=num_heads, head_dim=head_dim)
        ref_kvs.extend((k_r, v_r))

    assert jnp.allclose(result[0], h_ref, atol=2e-2, rtol=2e-2)
    for got, want in zip(result[1:], ref_kvs):
        assert got.shape == want.shape
        assert jnp.allclose(got, want, atol=2e-2, rtol=2e-2)

    print("KERNEL_OK")
</pallas_src>

<mosaic_0001>
module attributes {stable_mosaic.version = 11 : i64} {
  func.func @_falcon_decoder_layer_kernel(%arg0: i32, %arg1: memref<1x8x32xf32, #tpu.memory_space<vmem>>, %arg2: memref<1x8x8xf32, #tpu.memory_space<vmem>>, %arg3: memref<8x16xf32, #tpu.memory_space<vmem>>, %arg4: memref<8x16xf32, #tpu.memory_space<vmem>>, %arg5: memref<1x32xf32, #tpu.memory_space<vmem>>, %arg6: memref<1x32xf32, #tpu.memory_space<vmem>>, %arg7: memref<64x32xf32, #tpu.memory_space<vmem>>, %arg8: memref<32x32xf32, #tpu.memory_space<vmem>>, %arg9: memref<128x32xf32, #tpu.memory_space<vmem>>, %arg10: memref<32x128xf32, #tpu.memory_space<vmem>>, %arg11: memref<1x8x32xf32, #tpu.memory_space<vmem>>, %arg12: memref<1x8x16xf32, #tpu.memory_space<vmem>>, %arg13: memref<1x8x16xf32, #tpu.memory_space<vmem>>) attributes {dimension_semantics = [#tpu.dimension_semantics<parallel>], iteration_bounds = array<i64: 2>, scalar_prefetch = 0 : i64, scratch_operands = 0 : i64, tpu.core_type = #tpu.core_type<tc>, window_params = [{transform_indices = @transform_0, window_bounds = array<i64: 1, 8, 32>}, {transform_indices = @transform_1, window_bounds = array<i64: 1, 8, 8>}, {pipeline_mode = #tpu.pipeline_mode<synchronous>, transform_indices = @transform_2, window_bounds = array<i64: 8, 16>}, {pipeline_mode = #tpu.pipeline_mode<synchronous>, transform_indices = @transform_3, window_bounds = array<i64: 8, 16>}, {pipeline_mode = #tpu.pipeline_mode<synchronous>, transform_indices = @transform_4, window_bounds = array<i64: 1, 32>}, {pipeline_mode = #tpu.pipeline_mode<synchronous>, transform_indices = @transform_5, window_bounds = array<i64: 1, 32>}, {pipeline_mode = #tpu.pipeline_mode<synchronous>, transform_indices = @transform_6, window_bounds = array<i64: 64, 32>}, {pipeline_mode = #tpu.pipeline_mode<synchronous>, transform_indices = @transform_7, window_bounds = array<i64: 32, 32>}, {pipeline_mode = #tpu.pipeline_mode<synchronous>, transform_indices = @transform_8, window_bounds = array<i64: 128, 32>}, {pipeline_mode = #tpu.pipeline_mode<synchronous>, transform_indices = @transform_9, window_bounds = array<i64: 32, 128>}, {transform_indices = @transform_10, window_bounds = array<i64: 1, 8, 32>}, {transform_indices = @transform_11, window_bounds = array<i64: 1, 8, 16>}, {transform_indices = @transform_12, window_bounds = array<i64: 1, 8, 16>}]} {
    %c0 = arith.constant 0 : index
    %c0_0 = arith.constant 0 : index
    %c0_1 = arith.constant 0 : index
    %0 = vector.load %arg1[%c0, %c0_0, %c0_1] : memref<1x8x32xf32, #tpu.memory_space<vmem>>, vector<1x8x32xf32>
    %1 = vector.shape_cast %0 : vector<1x8x32xf32> to vector<8x32xf32>
    %c0_2 = arith.constant 0 : index
    %c0_3 = arith.constant 0 : index
    %c0_4 = arith.constant 0 : index
    %2 = vector.load %arg2[%c0_2, %c0_3, %c0_4] : memref<1x8x8xf32, #tpu.memory_space<vmem>>, vector<1x8x8xf32>
    %3 = vector.shape_cast %2 : vector<1x8x8xf32> to vector<8x8xf32>
    %c0_5 = arith.constant 0 : index
    %c0_6 = arith.constant 0 : index
    %4 = vector.load %arg3[%c0_5, %c0_6] : memref<8x16xf32, #tpu.memory_space<vmem>>, vector<8x16xf32>
    %c0_7 = arith.constant 0 : index
    %c0_8 = arith.constant 0 : index
    %5 = vector.load %arg4[%c0_7, %c0_8] : memref<8x16xf32, #tpu.memory_space<vmem>>, vector<8x16xf32>
    %cst = arith.constant dense<0.000000e+00> : vector<8xf32>
    %6 = vector.multi_reduction <add>, %1, %cst [1] : vector<8x32xf32> to vector<8xf32>
    %7 = vector.shape_cast %6 : vector<8xf32> to vector<8x1xf32>
    %cst_9 = arith.constant 3.200000e+01 : f32
    %8 = vector.broadcast %cst_9 : f32 to vector<8x1xf32>
    %9 = arith.divf %7, %8 : vector<8x1xf32>
    %10 = vector.broadcast %9 : vector<8x1xf32> to vector<8x32xf32>
    %11 = arith.subf %1, %10 : vector<8x32xf32>
    %12 = arith.mulf %11, %11 : vector<8x32xf32>
    %cst_10 = arith.constant dense<0.000000e+00> : vector<8xf32>
    %13 = vector.multi_reduction <add>, %12, %cst_10 [1] : vector<8x32xf32> to vector<8xf32>
    %14 = vector.shape_cast %13 : vector<8xf32> to vector<8x1xf32>
    %cst_11 = arith.constant 3.200000e+01 : f32
    %15 = vector.broadcast %cst_11 : f32 to vector<8x1xf32>
    %16 = arith.divf %14, %15 : vector<8x1xf32>
    %17 = vector.broadcast %9 : vector<8x1xf32> to vector<8x32xf32>
    %18 = arith.subf %1, %17 : vector<8x32xf32>
    %cst_12 = arith.constant 9.99999974E-6 : f32
    %19 = vector.broadcast %cst_12 : f32 to vector<8x1xf32>
    %20 = arith.addf %16, %19 : vector<8x1xf32>
    %21 = math.rsqrt %20 : vector<8x1xf32>
    %22 = vector.broadcast %21 : vector<8x1xf32> to vector<8x32xf32>
    %23 = arith.mulf %18, %22 : vector<8x32xf32>
    %c0_13 = arith.constant 0 : index
    %c0_14 = arith.constant 0 : index
    %24 = vector.load %arg5[%c0_13, %c0_14] : memref<1x32xf32, #tpu.memory_space<vmem>>, vector<1x32xf32>
    %25 = vector.shape_cast %24 : vector<1x32xf32> to vector<32xf32>
    %26 = vector.shape_cast %25 : vector<32xf32> to vector<1x32xf32>
    %27 = vector.broadcast %26 : vector<1x32xf32> to vector<8x32xf32>
    %28 = arith.mulf %23, %27 : vector<8x32xf32>
    %c0_15 = arith.constant 0 : index
    %c0_16 = arith.constant 0 : index
    %29 = vector.load %arg6[%c0_15, %c0_16] : memref<1x32xf32, #tpu.memory_space<vmem>>, vector<1x32xf32>
    %30 = vector.shape_cast %29 : vector<1x32xf32> to vector<32xf32>
    %31 = vector.shape_cast %30 : vector<32xf32> to vector<1x32xf32>
    %32 = vector.broadcast %31 : vector<1x32xf32> to vector<8x32xf32>
    %33 = arith.addf %28, %32 : vector<8x32xf32>
    %c0_17 = arith.constant 0 : index
    %c0_18 = arith.constant 0 : index
    %34 = vector.load %arg7[%c0_17, %c0_18] : memref<64x32xf32, #tpu.memory_space<vmem>>, vector<64x32xf32>
    %cst_19 = arith.constant dense<0.000000e+00> : vector<8x64xf32>
    %35 = tpu.matmul %33, %34, %cst_19 {dimension_numbers = #tpu.dot_dimension_numbers<[1], [1], [0], [0], [0, 0, 1, 0], [], []>} : vector<8x32xf32>, vector<64x32xf32>, vector<8x64xf32> -> vector<8x64xf32>
    %36 = vector.extract_strided_slice %35 {offsets = [0, 0], sizes = [8, 32], strides = [1, 1]} : vector<8x64xf32> to vector<8x32xf32>
    %37 = vector.extract_strided_slice %35 {offsets = [0, 32], sizes = [8, 16], strides = [1, 1]} : vector<8x64xf32> to vector<8x16xf32>
    %38 = vector.extract_strided_slice %35 {offsets = [0, 48], sizes = [8, 16], strides = [1, 1]} : vector<8x64xf32> to vector<8x16xf32>
    %39 = vector.extract_strided_slice %37 {offsets = [0, 8], sizes = [8, 8], strides = [1, 1]} : vector<8x16xf32> to vector<8x8xf32>
    %cst_20 = arith.constant 0.000000e+00 : f32
    %40 = vector.broadcast %cst_20 : f32 to vector<8x8xf32>
    %41 = arith.subf %40, %39 : vector<8x8xf32>
    %42 = vector.extract_strided_slice %37 {offsets = [0, 0], sizes = [8, 8], strides = [1, 1]} : vector<8x16xf32> to vector<8x8xf32>
    %43 = tpu.concatenate %41, %42 in 1 : vector<8x8xf32>, vector<8x8xf32> -> vector<8x16xf32>
    %44 = arith.mulf %37, %4 : vector<8x16xf32>
    %45 = arith.mulf %43, %5 : vector<8x16xf32>
    %46 = arith.addf %44, %45 : vector<8x16xf32>
    %47 = vector.extract_strided_slice %36 {offsets = [0, 0], sizes = [8, 16], strides = [1, 1]} : vector<8x32xf32> to vector<8x16xf32>
    %48 = vector.extract_strided_slice %47 {offsets = [0, 8], sizes = [8, 8], strides = [1, 1]} : vector<8x16xf32> to vector<8x8xf32>
    %cst_21 = arith.constant 0.000000e+00 : f32
    %49 = vector.broadcast %cst_21 : f32 to vector<8x8xf32>
    %50 = arith.subf %49, %48 : vector<8x8xf32>
    %51 = vector.extract_strided_slice %47 {offsets = [0, 0], sizes = [8, 8], strides = [1, 1]} : vector<8x16xf32> to vector<8x8xf32>
    %52 = tpu.concatenate %50, %51 in 1 : vector<8x8xf32>, vector<8x8xf32> -> vector<8x16xf32>
    %53 = arith.mulf %47, %4 : vector<8x16xf32>
    %54 = arith.mulf %52, %5 : vector<8x16xf32>
    %55 = arith.addf %53, %54 : vector<8x16xf32>
    %cst_22 = arith.constant dense<0.000000e+00> : vector<8x8xf32>
    %56 = tpu.matmul %55, %46, %cst_22 {dimension_numbers = #tpu.dot_dimension_numbers<[1], [1], [0], [0], [0, 0, 1, 0], [], []>} : vector<8x16xf32>, vector<8x16xf32>, vector<8x8xf32> -> vector<8x8xf32>
    %cst_23 = arith.constant 2.500000e-01 : f32
    %57 = vector.broadcast %cst_23 : f32 to vector<8x8xf32>
    %58 = arith.mulf %56, %57 : vector<8x8xf32>
    %59 = arith.addf %58, %3 : vector<8x8xf32>
    %cst_24 = arith.constant dense<0xFF800000> : vector<8xf32>
    %60 = vector.multi_reduction <maximumf>, %59, %cst_24 [1] : vector<8x8xf32> to vector<8xf32>
    %61 = vector.shape_cast %60 : vector<8xf32> to vector<8x1xf32>
    %62 = vector.broadcast %61 : vector<8x1xf32> to vector<8x8xf32>
    %63 = arith.subf %59, %62 : vector<8x8xf32>
    %64 = math.exp %63 : vector<8x8xf32>
    %cst_25 = arith.constant dense<0.000000e+00> : vector<8xf32>
    %65 = vector.multi_reduction <add>, %64, %cst_25 [1] : vector<8x8xf32> to vector<8xf32>
    %66 = vector.shape_cast %65 : vector<8xf32> to vector<8x1xf32>
    %67 = vector.broadcast %66 : vector<8x1xf32> to vector<8x8xf32>
    %68 = arith.divf %64, %67 : vector<8x8xf32>
    %cst_26 = arith.constant dense<0.000000e+00> : vector<8x16xf32>
    %69 = tpu.matmul %68, %38, %cst_26 {dimension_numbers = #tpu.dot_dimension_numbers<[1], [0], [0], [1], [0, 0, 1, 1], [], []>} : vector<8x8xf32>, vector<8x16xf32>, vector<8x16xf32> -> vector<8x16xf32>
    %70 = vector.extract_strided_slice %36 {offsets = [0, 16], sizes = [8, 16], strides = [1, 1]} : vector<8x32xf32> to vector<8x16xf32>
    %71 = vector.extract_strided_slice %70 {offsets = [0, 8], sizes = [8, 8], strides = [1, 1]} : vector<8x16xf32> to vector<8x8xf32>
    %cst_27 = arith.constant 0.000000e+00 : f32
    %72 = vector.broadcast %cst_27 : f32 to vector<8x8xf32>
    %73 = arith.subf %72, %71 : vector<8x8xf32>
    %74 = vector.extract_strided_slice %70 {offsets = [0, 0], sizes = [8, 8], strides = [1, 1]} : vector<8x16xf32> to vector<8x8xf32>
    %75 = tpu.concatenate %73, %74 in 1 : vector<8x8xf32>, vector<8x8xf32> -> vector<8x16xf32>
    %76 = arith.mulf %70, %4 : vector<8x16xf32>
    %77 = arith.mulf %75, %5 : vector<8x16xf32>
    %78 = arith.addf %76, %77 : vector<8x16xf32>
    %cst_28 = arith.constant dense<0.000000e+00> : vector<8x8xf32>
    %79 = tpu.matmul %78, %46, %cst_28 {dimension_numbers = #tpu.dot_dimension_numbers<[1], [1], [0], [0], [0, 0, 1, 0], [], []>} : vector<8x16xf32>, vector<8x16xf32>, vector<8x8xf32> -> vector<8x8xf32>
    %cst_29 = arith.constant 2.500000e-01 : f32
    %80 = vector.broadcast %cst_29 : f32 to vector<8x8xf32>
    %81 = arith.mulf %79, %80 : vector<8x8xf32>
    %82 = arith.addf %81, %3 : vector<8x8xf32>
    %cst_30 = arith.constant dense<0xFF800000> : vector<8xf32>
    %83 = vector.multi_reduction <maximumf>, %82, %cst_30 [1] : vector<8x8xf32> to vector<8xf32>
    %84 = vector.shape_cast %83 : vector<8xf32> to vector<8x1xf32>
    %85 = vector.broadcast %84 : vector<8x1xf32> to vector<8x8xf32>
    %86 = arith.subf %82, %85 : vector<8x8xf32>
    %87 = math.exp %86 : vector<8x8xf32>
    %cst_31 = arith.constant dense<0.000000e+00> : vector<8xf32>
    %88 = vector.multi_reduction <add>, %87, %cst_31 [1] : vector<8x8xf32> to vector<8xf32>
    %89 = vector.shape_cast %88 : vector<8xf32> to vector<8x1xf32>
    %90 = vector.broadcast %89 : vector<8x1xf32> to vector<8x8xf32>
    %91 = arith.divf %87, %90 : vector<8x8xf32>
    %cst_32 = arith.constant dense<0.000000e+00> : vector<8x16xf32>
    %92 = tpu.matmul %91, %38, %cst_32 {dimension_numbers = #tpu.dot_dimension_numbers<[1], [0], [0], [1], [0, 0, 1, 1], [], []>} : vector<8x8xf32>, vector<8x16xf32>, vector<8x16xf32> -> vector<8x16xf32>
    %93 = tpu.concatenate %69, %92 in 1 : vector<8x16xf32>, vector<8x16xf32> -> vector<8x32xf32>
    %c0_33 = arith.constant 0 : index
    %c0_34 = arith.constant 0 : index
    %94 = vector.load %arg8[%c0_33, %c0_34] : memref<32x32xf32, #tpu.memory_space<vmem>>, vector<32x32xf32>
    %cst_35 = arith.constant dense<0.000000e+00> : vector<8x32xf32>
    %95 = tpu.matmul %93, %94, %cst_35 {dimension_numbers = #tpu.dot_dimension_numbers<[1], [1], [0], [0], [0, 0, 1, 0], [], []>} : vector<8x32xf32>, vector<32x32xf32>, vector<8x32xf32> -> vector<8x32xf32>
    %c0_36 = arith.constant 0 : index
    %c0_37 = arith.constant 0 : index
    %96 = vector.load %arg9[%c0_36, %c0_37] : memref<128x32xf32, #tpu.memory_space<vmem>>, vector<128x32xf32>
    %cst_38 = arith.constant dense<0.000000e+00> : vector<8x128xf32>
    %97 = tpu.matmul %33, %96, %cst_38 {dimension_numbers = #tpu.dot_dimension_numbers<[1], [1], [0], [0], [0, 0, 1, 0], [], []>} : vector<8x32xf32>, vector<128x32xf32>, vector<8x128xf32> -> vector<8x128xf32>
    %98 = arith.mulf %97, %97 : vector<8x128xf32>
    %99 = arith.mulf %97, %98 : vector<8x128xf32>
    %cst_39 = arith.constant 4.471500e-02 : f32
    %100 = vector.broadcast %cst_39 : f32 to vector<8x128xf32>
    %101 = arith.mulf %100, %99 : vector<8x128xf32>
    %102 = arith.addf %97, %101 : vector<8x128xf32>
    %cst_40 = arith.constant 0.797884583 : f32
    %103 = vector.broadcast %cst_40 : f32 to vector<8x128xf32>
    %104 = arith.mulf %103, %102 : vector<8x128xf32>
    %105 = math.tanh %104 : vector<8x128xf32>
    %cst_41 = arith.constant 1.000000e+00 : f32
    %106 = vector.broadcast %cst_41 : f32 to vector<8x128xf32>
    %107 = arith.addf %106, %105 : vector<8x128xf32>
    %cst_42 = arith.constant 5.000000e-01 : f32
    %108 = vector.broadcast %cst_42 : f32 to vector<8x128xf32>
    %109 = arith.mulf %108, %107 : vector<8x128xf32>
    %110 = arith.mulf %97, %109 : vector<8x128xf32>
    %c0_43 = arith.constant 0 : index
    %c0_44 = arith.constant 0 : index
    %111 = vector.load %arg10[%c0_43, %c0_44] : memref<32x128xf32, #tpu.memory_space<vmem>>, vector<32x128xf32>
    %cst_45 = arith.constant dense<0.000000e+00> : vector<8x32xf32>
    %112 = tpu.matmul %110, %111, %cst_45 {dimension_numbers = #tpu.dot_dimension_numbers<[1], [1], [0], [0], [0, 0, 1, 0], [], []>} : vector<8x128xf32>, vector<32x128xf32>, vector<8x32xf32> -> vector<8x32xf32>
    %113 = arith.addf %1, %95 : vector<8x32xf32>
    %114 = arith.addf %113, %112 : vector<8x32xf32>
    %c0_46 = arith.constant 0 : index
    %c0_47 = arith.constant 0 : index
    %c0_48 = arith.constant 0 : index
    %115 = vector.load %arg11[%c0_46, %c0_47, %c0_48] : memref<1x8x32xf32, #tpu.memory_space<vmem>>, vector<1x8x32xf32>
    %116 = vector.shape_cast %115 : vector<1x8x32xf32> to vector<8x32xf32>
    %117 = vector.shape_cast %114 : vector<8x32xf32> to vector<1x8x32xf32>
    tpu.vector_store %arg11[%c0_46, %c0_47, %c0_48], %117 {strides = array<i32>} : memref<1x8x32xf32, #tpu.memory_space<vmem>>, vector<1x8x32xf32>,
    %c0_49 = arith.constant 0 : index
    %c0_50 = arith.constant 0 : index
    %c0_51 = arith.constant 0 : index
    %118 = vector.load %arg12[%c0_49, %c0_50, %c0_51] : memref<1x8x16xf32, #tpu.memory_space<vmem>>, vector<1x8x16xf32>
    %119 = vector.shape_cast %118 : vector<1x8x16xf32> to vector<8x16xf32>
    %120 = vector.shape_cast %46 : vector<8x16xf32> to vector<1x8x16xf32>
    tpu.vector_store %arg12[%c0_49, %c0_50, %c0_51], %120 {strides = array<i32>} : memref<1x8x16xf32, #tpu.memory_space<vmem>>, vector<1x8x16xf32>,
    %c0_52 = arith.constant 0 : index
    %c0_53 = arith.constant 0 : index
    %c0_54 = arith.constant 0 : index
    %121 = vector.load %arg13[%c0_52, %c0_53, %c0_54] : memref<1x8x16xf32, #tpu.memory_space<vmem>>, vector<1x8x16xf32>
    %122 = vector.shape_cast %121 : vector<1x8x16xf32> to vector<8x16xf32>
    %123 = vector.shape_cast %38 : vector<8x16xf32> to vector<1x8x16xf32>
    tpu.vector_store %arg13[%c0_52, %c0_53, %c0_54], %123 {strides = array<i32>} : memref<1x8x16xf32, #tpu.memory_space<vmem>>, vector<1x8x16xf32>,
    return
  }
  func.func @transform_0(%arg0: i32) -> (i32, i32, i32) {
    %c0_i32 = arith.constant 0 : i32
    %c0_i32_0 = arith.constant 0 : i32
    %c0_i32_1 = arith.constant 0 : i32
    return %arg0, %c0_i32, %c0_i32_0 : i32, i32, i32
  }
  func.func @transform_1(%arg0: i32) -> (i32, i32, i32) {
    %c0_i32 = arith.constant 0 : i32
    %c0_i32_0 = arith.constant 0 : i32
    %c0_i32_1 = arith.constant 0 : i32
    return %arg0, %c0_i32, %c0_i32_0 : i32, i32, i32
  }
  func.func @transform_2(%arg0: i32) -> (i32, i32) {
    %c0_i32 = arith.constant 0 : i32
    %c0_i32_0 = arith.constant 0 : i32
    %c0_i32_1 = arith.constant 0 : i32
    return %c0_i32, %c0_i32_0 : i32, i32
  }
  func.func @transform_3(%arg0: i32) -> (i32, i32) {
    %c0_i32 = arith.constant 0 : i32
    %c0_i32_0 = arith.constant 0 : i32
    %c0_i32_1 = arith.constant 0 : i32
    return %c0_i32, %c0_i32_0 : i32, i32
  }
  func.func @transform_4(%arg0: i32) -> (i32, i32) {
    %c0_i32 = arith.constant 0 : i32
    %c0_i32_0 = arith.constant 0 : i32
    %c0_i32_1 = arith.constant 0 : i32
    return %c0_i32, %c0_i32_0 : i32, i32
  }
  func.func @transform_5(%arg0: i32) -> (i32, i32) {
    %c0_i32 = arith.constant 0 : i32
    %c0_i32_0 = arith.constant 0 : i32
    %c0_i32_1 = arith.constant 0 : i32
    return %c0_i32, %c0_i32_0 : i32, i32
  }
  func.func @transform_6(%arg0: i32) -> (i32, i32) {
    %c0_i32 = arith.constant 0 : i32
    %c0_i32_0 = arith.constant 0 : i32
    %c0_i32_1 = arith.constant 0 : i32
    return %c0_i32, %c0_i32_0 : i32, i32
  }
  func.func @transform_7(%arg0: i32) -> (i32, i32) {
    %c0_i32 = arith.constant 0 : i32
    %c0_i32_0 = arith.constant 0 : i32
    %c0_i32_1 = arith.constant 0 : i32
    return %c0_i32, %c0_i32_0 : i32, i32
  }
  func.func @transform_8(%arg0: i32) -> (i32, i32) {
    %c0_i32 = arith.constant 0 : i32
    %c0_i32_0 = arith.constant 0 : i32
    %c0_i32_1 = arith.constant 0 : i32
    return %c0_i32, %c0_i32_0 : i32, i32
  }
  func.func @transform_9(%arg0: i32) -> (i32, i32) {
    %c0_i32 = arith.constant 0 : i32
    %c0_i32_0 = arith.constant 0 : i32
    %c0_i32_1 = arith.constant 0 : i32
    return %c0_i32, %c0_i32_0 : i32, i32
  }
  func.func @transform_10(%arg0: i32) -> (i32, i32, i32) {
    %c0_i32 = arith.constant 0 : i32
    %c0_i32_0 = arith.constant 0 : i32
    %c0_i32_1 = arith.constant 0 : i32
    return %arg0, %c0_i32, %c0_i32_0 : i32, i32, i32
  }
  func.func @transform_11(%arg0: i32) -> (i32, i32, i32) {
    %c0_i32 = arith.constant 0 : i32
    %c0_i32_0 = arith.constant 0 : i32
    %c0_i32_1 = arith.constant 0 : i32
    return %arg0, %c0_i32, %c0_i32_0 : i32, i32, i32
  }
  func.func @transform_12(%arg0: i32) -> (i32, i32, i32) {
    %c0_i32 = arith.constant 0 : i32
    %c0_i32_0 = arith.constant 0 : i32
    %c0_i32_1 = arith.constant 0 : i32
    return %arg0, %c0_i32, %c0_i32_0 : i32, i32, i32
  }
}

</mosaic_0001>

<bundles_post_ra>
// kernel: falcon_decoder_layer.1
= control target key start
LH: loop header
LB: loop body
LE: loop exit
PB: predicated region body
PF: predicated region fallthrough
CT: control target
= control target key end

     0   :  { %s1768_s0 = inlined_call_operand.vmem [shape: f32[2,8,32], index: 0, kind: input, shape index: {}]   ;;  %s1769_s1 = inlined_call_operand.vmem [shape: f32[2,8,8], index: 1, kind: input, shape index: {}]   ;;  %s1770_s2 = inlined_call_operand.vmem [shape: f32[8,16], index: 2, kind: input, shape index: {}]   ;;  %s1771_s3 = inlined_call_operand.vmem [shape: f32[8,16], index: 3, kind: input, shape index: {}]   ;;  %s1772_s4 = inlined_call_operand.vmem [shape: f32[1,32], index: 4, kind: input, shape index: {}]   ;;  %s1773_s5 = inlined_call_operand.vmem [shape: f32[1,32], index: 5, kind: input, shape index: {}]   ;;  %s1774_s6 = inlined_call_operand.vmem [shape: f32[64,32], index: 6, kind: input, shape index: {}]   ;;  %s1775_s7 = inlined_call_operand.vmem [shape: f32[32,32], index: 7, kind: input, shape index: {}]   ;;  %s1776_s8 = inlined_call_operand.vmem [shape: f32[128,32], index: 8, kind: input, shape index: {}]   ;;  %s1777_s9 = inlined_call_operand.vmem [shape: f32[32,128], index: 9, kind: input, shape index: {}]   ;;  %s1778_s10 = inlined_call_operand.hbm [shape: f32[2,8,32], index: 10, kind: output, shape index: {0}]   ;;  %s1779_s11 = inlined_call_operand.hbm [shape: f32[2,8,16], index: 11, kind: output, shape index: {1}]   ;;  %s1780_s12 = inlined_call_operand.hbm [shape: f32[2,8,16], index: 12, kind: output, shape index: {2}]  }
   0x1   :  { %1786 = sst [smem:[#allocation9_spill]] %s1768_s0 }
   0x2   :  { %1787 = sst [smem:[#allocation10_spill]] %s1769_s1 }
   0x3   :  { %1788 = sst [smem:[#allocation11_spill]] %s1770_s2 }
   0x4   :  { %1789 = sst [smem:[#allocation12_spill]] %s1771_s3 }
   0x5   :  { %1790 = sst [smem:[#allocation13_spill]] %s1772_s4 }
   0x6   :  { %1791 = sst [smem:[#allocation14_spill]] %s1773_s5 }
   0x7   :  { %18 = vsyncpa [#allocation3], 0 }
   0x8   :  { %20 = vsyncpa [#allocation3 + $0x1], 0 }
   0x9   :  { %21 = vsyncpa [#allocation5], 0 }
   0xa   :  { %23 = vsyncpa [#allocation5 + $0x1], 0  ;;  %s1430_s21 = smov 0   ;;  %s1432_s22 = smov 0  }
   0xb   :  { %s1434_s23 = smov 0   ;;  %s1436_s24 = smov 0  }
   0xc LB: > { %s1451_s25 = sadd.s32 4294967295, %s1353_s24   ;;  %s1781_s26 = sadd.s32 4294967294, %s1353_s24   ;;  %s1353_s24 = sphi %s1436_s24, %s1808_s24   ;;  %s1349_s23 = sphi %s1434_s23, %s1807_s23   ;;  %s1345_s22 = sphi %s1432_s22, %s1806_s22   ;;  %s1341_s21 = sphi %s1430_s21, %s1805_s21  }
   0xd   : > { %s1455_s27 = sadd.s32 1, %s1353_s24   ;;  %s256_s28 = sadd.s32 1, %s1349_s23 }
   0xe   : > { %s253_s29 = ssub.s32 %s1353_s24, %s1455_s27  ;;  %p266_p0 = scmp.ne.s32.totalorder %s1349_s23, %s1345_s22 }
   0xf   : > { %p254_p1 = scmp.eq.s32.totalorder %s253_s29, 0  ;;  %p267_p2 = scmp.eq.s32.totalorder %s1451_s25, 1 }
  0x10   : > { %p272_p3 = scmp.ne.s32.totalorder %s1345_s22, %s1341_s21  ;;  %p273_p4 = scmp.eq.s32.totalorder %s1781_s26, 1 }
  0x11   : > { %s1468_s30 = scalar_select %p254_p1, %s1349_s23, %s256_s28  }
  0x12   : > { %p1470_p5 = por %p267_p2, %p266_p0  ;;  %p1474_p6 = por %p273_p4, %p272_p3 }
  0x13   : > { %p1105_p7 = scmp.ge.s32.totalorder %s1353_s24, 1  ;;  %p381_p8 = scmp.lt.s32.totalorder %s1353_s24, 3 }
  0x15   : > { %p382_p9 = pnand %p1105_p7, %p381_p8 }
  0x16   : > { %p436_p10 = scmp.lt.s32.totalorder (!%p382_p9), %s1451_s25, 1  ;;  %s1794_s0 = sld [smem:[#allocation9_spill]] (!%p382_p9) }
  0x17   : > { %385 = sbr.rel (%p382_p9) target bundleno = 1570 (0x622), region = 60  ;;  %s1795_s2 = sld [smem:[#allocation11_spill]] (!%p382_p9) }
  0x18   : > { %s1356_s28 = smov (!%p382_p9), 32   ;;  %s1796_s4 = sld [smem:[#allocation13_spill]] (!%p382_p9) }
  0x19   : > { %s1797_s5 = sld [smem:[#allocation14_spill]] (!%p382_p9)  ;;  %s1358_s20 = smov (!%p382_p9), 88  }
  0x1a   : > { %s1359_s26 = smov (!%p382_p9), 120   ;;  %s1360_s29 = smov (!%p382_p9), 16  }
  0x1b   : > { %s1798_s3 = sld [smem:[#allocation12_spill]] (!%p382_p9)  ;;  %s1361_s18 = smov (!%p382_p9), 8  }
  0x1c   : > { %s1482_s15 = scalar_select %p436_p10, %s1451_s25, 1  ;;  %vm448_vm0 = vcmask 261120   ;;  %v1355_v2 = vmov 32.0   ;;  %v806_v3 = vld [vmem:[%s1776_s8 + $0x78] sm:$0xff]  ;;  %v805_v4 = vld [vmem:[%s1776_s8 + $0x70] sm:$0xff]  ;;  %v804_v8 = vld [vmem:[%s1776_s8 + $0x68] sm:$0xff] }
  0x1d   : > { %1217 = vrcp.f32 %v1355_v2  ;;  %1131 = vmatpush.xpose.msk.msra.mxu3 %vm448_vm0, %v806_v3  ;;  %v495_v5 = vld [vmem:[%s1774_s6 + $0x38] sm:$0xff]  ;;  %v803_v10 = vld [vmem:[%s1776_s8 + $0x60] sm:$0xff]  ;;  %v801_v14 = vld [vmem:[%s1776_s8 + $0x50] sm:$0xff]  ;;  %vm552_vm5 = vcmask 64512   ;;  %vm578_vm6 = vcmask 130048   ;;  %s1800_s1 = sld [smem:[#allocation10_spill]] }
  0x1e   : > { %s1782_s16 = sshll.u32 %s1482_s15, 3  ;;  %1111 = vmatpush.xpose.msk.msra.mxu0 %vm448_vm0, %v495_v5  ;;  %v802_v12 = vld [vmem:[%s1776_s8 + $0x58] sm:$0xff]  ;;  %v800_v16 = vld [vmem:[%s1776_s8 + $0x48] sm:$0xff]  ;;  %v799_v19 = vld [vmem:[%s1776_s8 + $0x40] sm:$0xff] }
  0x1f   : > { %s439_s19 = scalar_lea.vmem %s1794_s0, %s1782_s16  ;;  %v798_v22 = vld [vmem:[%s1776_s8 + $0x38] sm:$0xff]  ;;  %v494_v24 = vld [vmem:[%s1774_s6 + $0x30] sm:$0xff]  ;;  %v493_v26 = vld [vmem:[%s1774_s6 + $0x28] sm:$0xff]  ;;  %s1799_s16 = sshll.u32 %s1482_s15, 3 }
  0x20   : > { %v1490_v0 = vld [vmem:[%s439_s19] sm:$0xff]  ;;  %v797_v25 = vld [vmem:[%s1776_s8 + $0x30] sm:$0xff]  ;;  %v796_v27 = vld [vmem:[%s1776_s8 + $0x28] sm:$0xff]  ;;  %s1357_s19 = smov 104  }
  0x21   : > { %v449_v1 = vsel %vm448_vm0, %v1490_v0, 0.0  ;;  %1132 = vmatpush.xpose.msk.msra.mxu3 %vm448_vm0, %v805_v4  ;;  %v492_v28 = vld [vmem:[%s1774_s6 + $0x20] sm:$0xff]  ;;  %v491_v30 = vld [vmem:[%s1774_s6 + $0x18] sm:$0xff]  ;;  %v490_v32 = vld [vmem:[%s1774_s6 + $0x10] sm:$0xff] }
  0x22   : > { %450 = vadd.xlane.f32.xlu0 %v449_v1  ;;  %1112 = vmatpush.xpose.msk.msra.mxu0 %vm448_vm0, %v494_v24  ;;  %v795_v29 = vld [vmem:[%s1776_s8 + $0x20] sm:$0xff]  ;;  %v794_v31 = vld [vmem:[%s1776_s8 + $0x18] sm:$0xff]  ;;  %v793_v33 = vld [vmem:[%s1776_s8 + $0x10] sm:$0xff] }
  0x23   : > { %v1218_v6 = vpop.eup %1217  ;;  %v489_v34 = vld [vmem:[%s1774_s6 + $0x8] sm:$0xff]  ;;  %v488_v36 = vld [vmem:[%s1774_s6] sm:$0xff] }
  0x24   : > { %v453_v7 = vmul.f32 32.0, %v1218_v6  ;;  %vm457_vm1 = vweird.f32 %v1218_v6  ;;  %v792_v35 = vld [vmem:[%s1776_s8 + $0x8] sm:$0xff]  ;;  %v791_v37 = vld [vmem:[%s1776_s8] sm:$0xff] }
  0x25   : > { %1133 = vmatpush.xpose.msk.msra.mxu3 %vm448_vm0, %v804_v8  ;;  %v1595_v38 = vld [vmem:[%s1795_s2] sm:$0xff] }
  0x26   : > { %v454_v9 = vsub.f32 1.0, %v453_v7  ;;  %1113 = vmatpush.xpose.msk.msra.mxu0 %vm448_vm0, %v493_v26  ;;  %v1215_v48 = vld [vmem:[%s1796_s4] ss:$0 sm:$0xff] }
  0x27   : > { %v1216_v51 = vld [vmem:[%s1797_s5] ss:$0 sm:$0xff] }
  0x28   : > { %v455_v11 = vmul.f32 %v1218_v6, %v454_v9  ;;  %v447_v59 = vld [vmem:[%s1798_s3] sm:$0xff] }
  0x29   : > { %1134 = vmatpush.xpose.msk.msra.mxu3 %vm448_vm0, %v803_v10 }
  0x2a   : > { %v456_v13 = vadd.f32 %v1218_v6, %v455_v11  ;;  %1114 = vmatpush.xpose.msk.msra.mxu0 %vm448_vm0, %v492_v28 }
  0x2c   : > { %v458_v15 = vsel %vm457_vm1, %v1218_v6, %v456_v13 }
  0x2d   : > { %1135 = vmatpush.xpose.msk.msra.mxu3 %vm448_vm0, %v802_v12 }
  0x2e   : > { %1115 = vmatpush.xpose.msk.msra.mxu0 %vm448_vm0, %v491_v30 }
  0x31   : > { %1136 = vmatpush.xpose.msk.msra.mxu3 %vm448_vm0, %v801_v14 }
  0x32   : > { %1116 = vmatpush.xpose.msk.msra.mxu0 %vm448_vm0, %v490_v32 }
  0x35   : > { %1137 = vmatpush.xpose.msk.msra.mxu3 %vm448_vm0, %v800_v16 }
  0x36   : > { %1117 = vmatpush.xpose.msk.msra.mxu0 %vm448_vm0, %v489_v34 }
  0x39   : > { %1138 = vmatpush.xpose.msk.msra.mxu3 %vm448_vm0, %v799_v19 }
  0x3a   : > { %1118 = vmatpush.xpose.msk.msra.mxu0 %vm448_vm0, %v488_v36 }
  0x3d   : > { %1139 = vmatpush.xpose.msk.msra.mxu3 %vm448_vm0, %v798_v22 }
  0x41   : > { %1140 = vmatpush.xpose.msk.msra.mxu3 %vm448_vm0, %v797_v25 }
  0x45   : > { %1141 = vmatpush.xpose.msk.msra.mxu3 %vm448_vm0, %v796_v27 }
  0x49   : > { %1142 = vmatpush.xpose.msk.msra.mxu3 %vm448_vm0, %v795_v29 }
  0x4d   : > { %1143 = vmatpush.xpose.msk.msra.mxu3 %vm448_vm0, %v794_v31 }
  0x51   : > { %1144 = vmatpush.xpose.msk.msra.mxu3 %vm448_vm0, %v793_v33 }
  0x55   : > { %1145 = vmatpush.xpose.msk.msra.mxu3 %vm448_vm0, %v792_v35 }
  0x59   : > { %1146 = vmatpush.xpose.msk.msra.mxu3 %vm448_vm0, %v791_v37 }
  0x95   : > { %v451_v17 = vpop.xlane.xlu0 %450 }
  0x96   : > { %v459_v18 = vmul.f32 %v458_v15, %v451_v17 }
  0x98   : > { %v460_v20 = vsub.f32 %v1490_v0, %v459_v18 }
  0x9a   : > { %v461_v21 = vmul.f32 %v460_v20, %v460_v20 }
  0x9c   : > { %v462_v23 = vsel %vm448_vm0, %v461_v21, 0.0 }
  0x9d   : > { %463 = vadd.xlane.f32.xlu0 %v462_v23 }
  0xb1   : > { %555 = vrot.lane.b32.xlu0 %v1595_v38, %s1356_s28 }
 0x110   : > { %v464_v39 = vpop.xlane.xlu0 %463 }
 0x111   : > { %v465_v40 = vmul.f32 %v464_v39, %v458_v15 }
 0x113   : > { %v466_v41 = vadd.f32 1e-05, %v465_v40 }
 0x115   : > { %1219 = vrsqrt.f32 %v466_v41  ;;  %vm473_vm3 = vweird.f32 %v466_v41 }
 0x11b   : > { %v1220_v42 = vpop.eup %1219 }
 0x11c   : > { %v468_v43 = vmul.f32 %v1220_v42, %v466_v41  ;;  %vm474_vm2 = vweird.f32 %v1220_v42 }
 0x11d   : > { %vm475_vm4 = vmor %vm473_vm3, %vm474_vm2 }
 0x11e   : > { %v469_v44 = vmul.f32 %v1220_v42, %v468_v43 }
 0x120   : > { %v470_v45 = vmul.f32 0.5, %v469_v44 }
 0x122   : > { %v471_v46 = vsub.f32 1.5, %v470_v45 }
 0x123   : > { %v556_v2 = vpop.permute.xlu0 %555 }
 0x124   : > { %v472_v47 = vmul.f32 %v1220_v42, %v471_v46 }
 0x126   : > { %v476_v49 = vsel %vm475_vm4, %v1220_v42, %v472_v47 }
 0x127   : > { %v477_v50 = vmul.f32 %v476_v49, %v460_v20 }
 0x129   : > { %v482_v52 = vmul.f32 %v1215_v48, %v477_v50 }
 0x12b   : > { %v487_v53 = vadd.f32 %v1216_v51, %v482_v52  ;;  %v887_v52 = vld [vmem:[%s1777_s9 + $0x18] sm:$0xff] }
 0x12d   : > { %1119 = vmatmul.msk.f32.vlgmr.msra.gmra.mxu0 %vm448_vm0, %v487_v53  ;;  %1147 = vmatmul.msk.f32.vlgmr.msra.gmra.mxu3 %vm448_vm0, %v487_v53 }
 0x1aa   : > { %v1607_v54 = vpop.f32.mrf.mxu0 }
 0x1ab   : > { %v543_v55 = vsub.f32 0.0, %v1607_v54  ;;  %v558_v3 = vmul.f32 %v556_v2, %v1607_v54  ;;  %v572_v15 = vmul.f32 %v1607_v54, %v1595_v38 }
 0x1ad   : > { %656 = vrot.lane.b32.xlu2 %v543_v55, %s1357_s19  ;;  %545 = vrot.lane.b32.xlu1 %v543_v55, %s1358_s20  ;;  %s1783_s20 = sand.u32 1, %s1345_s22  }
 0x1b0   : > { %v872_v46 = vpop.f32.mrf.mxu3 }
 0x1b1   : > { %v875_v50 = vmul.f32 %v872_v46, %v872_v46 }
 0x1b3   : > { %v876_v53 = vmul.f32 %v875_v50, %v872_v46 }
 0x1b5   : > { %659 = vrot.lane.b32.xlu2 %v1607_v54, %s1359_s26  ;;  %549 = vrot.lane.b32.xlu1 %v1607_v54, %s1357_s19  ;;  %s1362_s19 = smov 96  }
 0x1bd   : > { %663 = vrot.lane.b32.xlu2 %v1595_v38, %s1360_s29 }
 0x1c5   : > { %565 = vrot.lane.b32.xlu2 %v543_v55, %s1359_s26  ;;  %s1628_s26 = sshll.u32 %s1783_s20, 3  ;;  %s1364_s20 = smov 80   ;;  %v877_v55 = vmul.f32 0.044715, %v876_v53 }
 0x1c6   : > { %s1785_s17 = scalar_lea.vmem [#allocation4], %s1628_s26  ;;  %s1784_s15 = scalar_lea.vmem [#allocation6], %s1628_s26 }
 0x207   : > { %v657_v57 = vpop.permute.xlu2 %656 }
 0x20f   : > { %v660_v62 = vpop.permute.xlu2 %659 }
 0x210   : > { %v662_v63 = vsel %vm552_vm5, %v657_v57, %v660_v62 }
 0x211   : > { %v667_v1 = vmul.f32 %v662_v63, %v447_v59 }
 0x217   : > { %v664_v6 = vpop.permute.xlu2 %663 }
 0x218   : > { %v666_v7 = vmul.f32 %v664_v6, %v1607_v54 }
 0x21f   : > { %v546_v56 = vpop.permute.xlu1 %545  ;;  %v566_v10 = vpop.permute.xlu2 %565 }
 0x227   : > { %v550_v58 = vpop.permute.xlu1 %549 }
 0x228   : > { %v553_v60 = vsel %vm552_vm5, %v546_v56, %v550_v58  ;;  %v885_v56 = vld [vmem:[%s1777_s9 + $0x8] sm:$0xff]  ;;  %v878_v58 = vadd.f32 %v877_v55, %v872_v46 }
 0x229   : > { %v559_v61 = vmul.f32 %v553_v60, %v447_v59 }
 0x22a   : > { %v879_v60 = vmul.f32 0.7978846, %v878_v58 }
 0x22b   : > { %561 = vrot.lane.b32.xlu1 %v559_v61, %s1356_s28  ;;  %s1363_s28 = smov 112  }
 0x233   : > { %669 = vrot.lane.b32.xlu1 %v667_v1, %s1360_s29 }
 0x23b   : > { %568 = vrot.lane.b32.xlu1 %v1607_v54, %s1361_s18  ;;  %s1686_s18 = sshll.u32 %s1451_s25, 3 }
 0x29d   : > { %v562_v4 = vpop.permute.xlu1 %561 }
 0x29e   : > { %v564_v5 = vadd.f32 %v562_v4, %v558_v3 }
 0x2a0   : > { %576 = vrot.lane.b32.xlu2 %v564_v5, %s1362_s19 }
 0x2a5   : > { %v670_v8 = vpop.permute.xlu1 %669 }
 0x2a6   : > { %v672_v9 = vadd.f32 %v670_v8, %v666_v7 }
 0x2a8   : > { %674 = vrot.lane.b32.xlu0 %v672_v9, %s1363_s28  ;;  %s443_s28 = scalar_lea.vmem %s1800_s1, %s1799_s16  ;;  %s1801_s16 = scalar_lea.vmem [#allocation4], %s1628_s26 }
 0x2a9   : > { %v445_v19 = vld [vmem:[%s443_s28] sm:$0xff]  ;;  %s1802_s1 = scalar_lea.vmem [#allocation6], %s1628_s26 }
 0x2ad   : > { %v569_v11 = vpop.permute.xlu1 %568 }
 0x2ae   : > { %v571_v12 = vsel %vm552_vm5, %v566_v10, %v569_v11 }
 0x2af   : > { %v573_v13 = vmul.f32 %v571_v12, %v447_v59  ;;  %v884_v59 = vld [vmem:[%s1777_s9] sm:$0xff] }
 0x2b1   : > { %v574_v16 = vadd.f32 %v573_v13, %v572_v15  ;;  %v755_v13 = vld [vmem:[%s1775_s7 + $0x18] sm:$0xff]  ;;  %v753_v15 = vld [vmem:[%s1775_s7 + $0x8] sm:$0xff] }
 0x2fa   : > { %v577_v14 = vpop.permute.xlu2 %576 }
 0x2fb   : > { %1120 = vmatpush.xpose.msk.msra.mxu1 %vm578_vm6, %v577_v14  ;;  %912 = vst.msk [vmem:[%s1785_s17] sm:$0xff] %vm578_vm6, %v577_v14  ;;  %s919_s17 = sand.u32 1, %s1451_s25   ;;  %s1251_s25 = scalar_lea.hbm %s1779_s11, 16 }
 0x2fc   : > { %s1701_s2 = scalar_lea.sflag [#allocation5], %s919_s17 }
 0x2fe   : > { %1121 = vmatmul.msk.f32.vlgmr.msra.gmra.mxu1 %vm578_vm6, %v574_v16  ;;  %v752_v16 = vld [vmem:[%s1775_s7] sm:$0xff] }
 0x2ff   : > { %1123 = vmatpush.xpose.msk.msrb.mxu1 %vm578_vm6, %v577_v14  ;;  %v754_v14 = vld [vmem:[%s1775_s7 + $0x10] sm:$0xff] }
 0x303   : > { %1126 = vmatpush.xpose.msk.msra.mxu1 %vm448_vm0, %v755_v13 }
 0x307   : > { %1127 = vmatpush.xpose.msk.msra.mxu1 %vm448_vm0, %v754_v14 }
 0x30b   : > { %1128 = vmatpush.xpose.msk.msra.mxu1 %vm448_vm0, %v753_v15 }
 0x30f   : > { %1129 = vmatpush.xpose.msk.msra.mxu1 %vm448_vm0, %v752_v16 }
 0x31a   : > { %v675_v17 = vpop.permute.xlu0 %674 }
 0x31b   : > { %1124 = vmatmul.msk.f32.vlgmr.msrb.gmra.mxu1 %vm578_vm6, %v675_v17 }
 0x37b   : > { %v601_v18 = vpop.f32.mrf.mxu1 }
 0x37c   : > { %v604_v20 = vmul.f32 0.25, %v601_v18 }
 0x37e   : > { %v605_v21 = vadd.f32 %v604_v20, %v445_v19 }
 0x380   : > { %v606_v22 = vsel %vm552_vm5, %v605_v21, -inf }
 0x381   : > { %607 = vmax.xlane.f32.xlu1 %v606_v22 }
 0x398   : > { %v695_v23 = vpop.f32.mrf.mxu1 }
 0x399   : > { %v698_v24 = vmul.f32 0.25, %v695_v23 }
 0x39a   : > { %630 = vrot.lane.b32.xlu1 %v1607_v54, %s1364_s20  ;;  %v886_v54 = vld [vmem:[%s1777_s9 + $0x10] sm:$0xff]  ;;  %s949_s20 = scalar_lea.hbm %s1779_s11, %s1686_s18 }
 0x39b   : > { %v699_v25 = vadd.f32 %v698_v24, %v445_v19  ;;  %s953_s0 = sshll.u32 %s949_s20, 4  ;;  %s954_s0 = int_to_ptr.hbm [resolvable:$true] %s953_s0 }
 0x39c   : > { %s1245_s3 = sshra.s32 %s954_s0, 4  ;;  %s1246_s3 = int_to_ptr.hbm [resolvable:$true] %s1245_s3 }
 0x39d   : > { %v700_v26 = vsel %vm552_vm5, %v699_v25, -inf  ;;  %s1247_s4 = scalar_lea.hbm %s1246_s3, 8  ;;  %p1252_p0 = scmp.lt.s32.totalorder %s1246_s3, %s1779_s11 }
 0x39e   : > { %701 = vmax.xlane.f32.xlu2 %v700_v26  ;;  %p1248_p11 = scmp.ne.s32.totalorder %s1246_s3, %s1247_s4  ;;  %p1253_p1 = scmp.lt.s32.totalorder %s1251_s25, %s1247_s4 }
 0x3a0   : > { %p1249_p12 = pnand %p1248_p11, %p1470_p5  ;;  %p1254_p2 = por %p1253_p1, %p1252_p0 }
 0x3a2   : > { %p1250_p13 = pneg %p1249_p12 }
 0x3a4   : > { %p1255_p3 = pnand %p1254_p2, %p1250_p13 }
 0x3f4   : > { %v608_v27 = vpop.xlane.xlu1 %607 }
 0x3f5   : > { %v609_v28 = vsub.f32 %v605_v21, %v608_v27 }
 0x3f7   : > { %v610_v29 = vmul.f32 1.442695, %v609_v28 }
 0x3f9   : > { %1221 = vpow2.f32 %v610_v29 }
 0x3ff   : > { %v1222_v30 = vpop.eup %1221 }
 0x400   : > { %v612_v31 = vsel %vm552_vm5, %v1222_v30, 0.0 }
 0x401   : > { %613 = vadd.xlane.f32.xlu0 %v612_v31 }
 0x40c   : > { %v631_v32 = vpop.permute.xlu1 %630 }
 0x40d   : > { %913 = vst.msk [vmem:[%s1784_s15] sm:$0xff] %vm578_vm6, %v631_v32  ;;  %651 = vmatpush.msra.mxu2 %v631_v32  ;;  %s951_s15 = sshll.u32 %s1801_s16, 4  ;;  %s952_s15 = int_to_ptr.vmem [resolvable:$true] %s951_s15 }
 0x40f   : > { %742 = vmatpush.msrb.mxu2 %v631_v32 }
 0x411   : > { %v702_v33 = vpop.xlane.xlu2 %701 }
 0x412   : > { %v703_v34 = vsub.f32 %v699_v25, %v702_v33 }
 0x414   : > { %v704_v35 = vmul.f32 1.442695, %v703_v34 }
 0x416   : > { %1223 = vpow2.f32 %v704_v35 }
 0x41c   : > { %v1224_v36 = vpop.eup %1223 }
 0x41d   : > { %v706_v37 = vsel %vm552_vm5, %v1224_v36, 0.0 }
 0x41e   : > { %707 = vadd.xlane.f32.xlu2 %v706_v37 }
 0x474   : > { %v614_v38 = vpop.xlane.xlu0 %613 }
 0x475   : > { %1225 = vrcp.f32 %v614_v38  ;;  %v626_v42 = vand.u32 2147483648, %v614_v38  ;;  %v624_v44 = vand.u32 2147483647, %v614_v38  ;;  %vm620_vm8 = vweird.f32 %v614_v38 }
 0x477   : > { %v627_v47 = vor.u32 1.1754944e-38, %v626_v42  ;;  %vm625_vm10 = vcmp.eq.f32.partialorder %v624_v44, 8.507059e+37 }
 0x47b   : > { %v1226_v39 = vpop.eup %1225 }
 0x47c   : > { %v616_v40 = vmul.f32 %v1226_v39, %v614_v38  ;;  %vm621_vm7 = vweird.f32 %v1226_v39 }
 0x47d   : > { %vm622_vm9 = vmor %vm620_vm8, %vm621_vm7 }
 0x47e   : > { %v617_v41 = vsub.f32 1.0, %v616_v40 }
 0x480   : > { %v618_v43 = vmul.f32 %v1226_v39, %v617_v41 }
 0x482   : > { %v619_v45 = vadd.f32 %v1226_v39, %v618_v43 }
 0x484   : > { %v623_v48 = vsel %vm622_vm9, %v1226_v39, %v619_v45 }
 0x485   : > { %v628_v49 = vsel %vm625_vm10, %v627_v47, %v623_v48 }
 0x486   : > { %v629_v51 = vmul.f32 %v1222_v30, %v628_v49 }
 0x488   : > { %1122 = vmatmul.msk.f32.vlgmr.msra.gmra.mxu2 %vm552_vm5, %v629_v51 }
 0x489   : > { %900 = vmatpush.xpose.msra.mxu2 %v887_v52 }
 0x48d   : > { %901 = vmatpush.xpose.msra.mxu2 %v886_v54 }
 0x491   : > { %v708_v57 = vpop.xlane.xlu2 %707  ;;  %902 = vmatpush.xpose.msra.mxu2 %v885_v56 }
 0x492   : > { %1227 = vrcp.f32 %v708_v57  ;;  %v720_v1 = vand.u32 2147483648, %v708_v57  ;;  %v718_v3 = vand.u32 2147483647, %v708_v57  ;;  %vm714_vm12 = vweird.f32 %v708_v57 }
 0x493   : > { %1229 = vtanh.f32 %v879_v60 }
 0x494   : > { %v721_v6 = vor.u32 1.1754944e-38, %v720_v1  ;;  %vm719_vm14 = vcmp.eq.f32.partialorder %v718_v3, 8.507059e+37 }
 0x495   : > { %903 = vmatpush.xpose.msra.mxu2 %v884_v59 }
 0x498   : > { %v1228_v61 = vpop.eup %1227 }
 0x499   : > { %v710_v62 = vmul.f32 %v1228_v61, %v708_v57  ;;  %vm715_vm11 = vweird.f32 %v1228_v61  ;;  %v1230_v5 = vpop.eup %1229 }
 0x49a   : > { %vm716_vm13 = vmor %vm714_vm12, %vm715_vm11  ;;  %v881_v9 = vadd.f32 1.0, %v1230_v5 }
 0x49b   : > { %v711_v63 = vsub.f32 1.0, %v710_v62 }
 0x49c   : > { %v882_v11 = vmul.f32 0.5, %v881_v9 }
 0x49d   : > { %v712_v2 = vmul.f32 %v1228_v61, %v711_v63 }
 0x49e   : > { %v883_v12 = vmul.f32 %v882_v11, %v872_v46 }
 0x49f   : > { %v713_v4 = vadd.f32 %v1228_v61, %v712_v2 }
 0x4a1   : > { %v717_v7 = vsel %vm716_vm13, %v1228_v61, %v713_v4 }
 0x4a2   : > { %v722_v8 = vsel %vm719_vm14, %v721_v6, %v717_v7 }
 0x4a3   : > { %v723_v10 = vmul.f32 %v1224_v36, %v722_v8 }
 0x4a5   : > { %1125 = vmatmul.msk.f32.vlgmr.msrb.gmra.mxu2 %vm552_vm5, %v723_v10 }
 0x4ad   : > { %904 = vmatmul.f32.vlgmr.msra.gmra.mxu2 %v883_v12 }
 0x50b   : > { %v653_v17 = vpop.f32.mrf.mxu2 }
 0x528   : > { %v744_v18 = vpop.f32.mrf.mxu2 }
 0x529   : > { %748 = vrot.lane.b32.xlu0 %v744_v18, %s1360_s29  ;;  %s1699_s29 = sshll.u32 %s1802_s1, 4  ;;  %s966_s29 = int_to_ptr.vmem [resolvable:$true] %s1699_s29 }
 0x59b   : > { %v749_v19 = vpop.permute.xlu0 %748 }
 0x59c   : > { %v751_v20 = vsel %vm578_vm6, %v653_v17, %v749_v19 }
 0x59d   : > { %1130 = vmatmul.msk.f32.vlgmr.msra.gmra.mxu1 %vm448_vm0, %v751_v20 }
 0x59e   : > { %1258 = shalt.err (!%p1255_p3)
}
 0x59f   : > { %1157 = dma.vmem_to_hbm [thread:$0]  (%p1470_p5), %s952_s15, 128, %s954_s0, %s1701_s2  }
 0x5a0   : > { %s963_s17 = scalar_lea.hbm %s1780_s12, %s1686_s18  ;;  %s1279_s25 = scalar_lea.hbm %s1780_s12, 16 }
 0x5a1   : > { %s967_s19 = sshll.u32 %s963_s17, 4  ;;  %s968_s19 = int_to_ptr.hbm [resolvable:$true] %s967_s19 }
 0x5a2   : > { %s1273_s5 = sshra.s32 %s968_s19, 4  ;;  %s1274_s5 = int_to_ptr.hbm [resolvable:$true] %s1273_s5 }
 0x5a3   : > { %s1275_s3 = scalar_lea.hbm %s1274_s5, 8  ;;  %p1280_p9 = scmp.lt.s32.totalorder %s1274_s5, %s1780_s12 }
 0x5a4   : > { %p1276_p4 = scmp.ne.s32.totalorder %s1274_s5, %s1275_s3  ;;  %p1281_p10 = scmp.lt.s32.totalorder %s1279_s25, %s1275_s3 }
 0x5a6   : > { %p1277_p7 = pnand %p1276_p4, %p1470_p5  ;;  %p1282_p11 = por %p1281_p10, %p1280_p9 }
 0x5a8   : > { %p1278_p8 = pneg %p1277_p7 }
 0x5aa   : > { %p1283_p12 = pnand %p1282_p11, %p1278_p8 }
 0x5ac   : > { %1286 = shalt.err (!%p1283_p12)
}
 0x5ad   : > { %1158 = dma.vmem_to_hbm [thread:$0]  (%p1470_p5), %s966_s29, 128, %s968_s19, %s1701_s2   ;;  %v905_v23 = vpop.f32.mrf.mxu2 }
 0x5ae   : > { %s935_s20 = scalar_lea.hbm %s1778_s10, %s1686_s18  ;;  %s421_s17 = scalar_lea.vmem [#allocation2], %s1628_s26 }
 0x5af   : > { %s937_s4 = sshll.u32 %s421_s17, 4  ;;  %s939_s5 = sshll.u32 %s935_s20, 4  ;;  %s938_s4 = int_to_ptr.vmem [resolvable:$true] %s937_s4  ;;  %s940_s5 = int_to_ptr.hbm [resolvable:$true] %s939_s5 }
 0x5b0   : > { %s1803_s3 = sand.u32 1, %s1345_s22   ;;  %s1301_s2 = sshra.s32 %s940_s5, 4  ;;  %s1302_s2 = int_to_ptr.hbm [resolvable:$true] %s1301_s2 }
 0x5b1   : > { %s915_s28 = scalar_lea.sflag [#allocation3], %s1803_s3  ;;  %s1303_s29 = scalar_lea.hbm %s1302_s2, 8 }
 0x5b2   : > { %p1304_p13 = scmp.ne.s32.totalorder %s1302_s2, %s1303_s29  ;;  %s1307_s19 = scalar_lea.hbm %s1778_s10, 16 }
 0x5b3   : > { %p1308_p2 = scmp.lt.s32.totalorder %s1302_s2, %s1778_s10  ;;  %p1309_p3 = scmp.lt.s32.totalorder %s1307_s19, %s1303_s29 }
 0x5b4   : > { %p1305_p0 = pnand %p1304_p13, %p1470_p5 }
 0x5b5   : > { %p1310_p4 = por %p1309_p3, %p1308_p2 }
 0x5b6   : > { %p1306_p1 = pneg %p1305_p0 }
 0x5b8   : > { %p1311_p7 = pnand %p1310_p4, %p1306_p1 }
 0x61a   : > { %v788_v21 = vpop.f32.mrf.mxu1 }
 0x61b   : > { %v908_v22 = vadd.f32 %v788_v21, %v1490_v0 }
 0x61d   : > { %v909_v24 = vadd.f32 %v908_v22, %v905_v23 }
 0x61f   : > { %910 = vst.msk [vmem:[%s421_s17] sm:$0xff] %vm448_vm0, %v909_v24 }
 0x620   : > { %1314 = shalt.err (!%p1311_p7)
}
 0x621   : > { %1156 = dma.vmem_to_hbm [thread:$0]  (%p1470_p5), %s938_s4, 128, %s940_s5, %s915_s28  }
 0x622 PF: > { %p1172_p8 = scmp.ge.s32.totalorder %s1353_s24, 2  ;;  %s979_s0 = sand.u32 1, %s1341_s21  }
 0x623   : > { %s980_s15 = scalar_lea.sflag [#allocation3], %s979_s0 }
 0x624   : > { %p1163_p9 = pnand %p1172_p8, %p1474_p6 }
 0x626   : > { %p1164_p10 = pneg %p1163_p9 }
 0x628   : > { %1332 = dma.done.wait (%p1164_p10), %s980_s15, 128  }
 0x629   : > { %1334 = vsyncadd (%p1164_p10), %s980_s15, 4294967168  ;;  %s1804_s1 = sadd.s32 4294967294, %s1353_s24  }
 0x62a   : > { %s989_s20 = sand.u32 1, %s1804_s1  }
 0x62b   : > { %s990_s17 = scalar_lea.sflag [#allocation5], %s989_s20 }
 0x62c   : > { %1336 = dma.done.wait (%p1164_p10), %s990_s17, 256  }
 0x62d   : > { %1338 = vsyncadd (%p1164_p10), %s990_s17, 4294967040  ;;  %p26_p5 = scmp.ge.s32.totalorder %s1455_s27, 4   ;;  %s1805_s21 = smov %s1345_s22 }
 0x62e   : > { %s1806_s22 = smov %s1349_s23  ;;  %s1807_s23 = smov %s1468_s30 }
 0x62f   : > { %s1808_s24 = smov %s1455_s27  ;;  %28 = sbr.rel (!%p26_p5) target bundleno = 12 (0xc), region = 130 }
 0x634   :  { %1006 = vsyncpa [#allocation3], 1 }
 0x635   :  { %1008 = vsyncpa [#allocation3 + $0x1], 1 }
 0x636   :  { %1009 = vsyncpa [#allocation5], 1 }
 0x637   :  { %1011 = vsyncpa [#allocation5 + $0x1], 1 }

</bundles_post_ra>
